<compile_context>
chip_gen: v7x
topology: tpu7x:2x2x1
jax: 0.10.0
libtpu: 0.0.40
codegen_flags: <defaults>
</compile_context>

<pallas_src>
import jax
import jax.numpy as jnp
from jax.experimental import pallas as pl
from jax.experimental.pallas import tpu as pltpu


def _round_up(n, m):
    return ((n + m - 1) // m) * m


def _two_layer_kernel(x_ref, w1_ref, b1_ref, w2_ref, b2_ref, w3_ref, b3_ref,
                      o_ref):
    x = x_ref[...]                                                # (TB, Dp) bf16
    # fc1 + ReLU (MXU bf16 -> f32 accumulate, bias/ReLU in f32 on the VPU)
    h1 = jnp.dot(x, w1_ref[...], preferred_element_type=jnp.float32)
    h1 = jnp.maximum(h1 + b1_ref[...], 0.0)
    # TODO(synk): training-mode dropout would use pltpu.prng_seed +
    # pltpu.prng_random_bits to build a keep-mask; identity here (eval mode).
    # fc2 + ReLU
    h2 = jnp.dot(h1.astype(jnp.bfloat16), w2_ref[...],
                 preferred_element_type=jnp.float32)
    h2 = jnp.maximum(h2 + b2_ref[...], 0.0)
    # fc3 (lane-dense 128-wide padded output -> unmasked full-lane stores)
    y = jnp.dot(h2.astype(jnp.bfloat16), w3_ref[...],
                preferred_element_type=jnp.float32)
    o_ref[...] = y + b3_ref[...]


def two_layer_nn(x, w1, b1, w2, b2, w3, b3, *, tb=128, lane=128):
    """Fused TwoLayerNN forward (fc1 -> relu -> fc2 -> relu -> fc3)."""
    B, d_in = x.shape
    hid = w1.shape[1]
    out_dim = w3.shape[1]

    # Pad all feature dims to MXU/lane-native widths; pad batch to the tile.
    d_in_p = _round_up(d_in, lane)
    hid_p = _round_up(hid, lane)
    out_p = _round_up(out_dim, lane)
    b_p = _round_up(B, tb)

    f32 = jnp.float32
    bf16 = jnp.bfloat16
    xp = jnp.pad(x.astype(f32), ((0, b_p - B), (0, d_in_p - d_in))).astype(bf16)
    w1p = jnp.pad(w1, ((0, d_in_p - d_in), (0, hid_p - hid))).astype(bf16)
    w2p = jnp.pad(w2, ((0, hid_p - hid), (0, hid_p - hid))).astype(bf16)
    w3p = jnp.pad(w3, ((0, hid_p - hid), (0, out_p - out_dim))).astype(bf16)
    b1p = jnp.pad(b1.reshape(1, -1).astype(f32), ((0, 0), (0, hid_p - hid)))
    b2p = jnp.pad(b2.reshape(1, -1).astype(f32), ((0, 0), (0, hid_p - hid)))
    b3p = jnp.pad(b3.reshape(1, -1).astype(f32), ((0, 0), (0, out_p - out_dim)))

    grid = (b_p // tb,)
    # Weights/biases: constant index_map -> DMA'd once, resident across steps.
    resident = lambda shape: pl.BlockSpec(shape, lambda i: (0,) * len(shape))

    out = pl.pallas_call(
        _two_layer_kernel,
        out_shape=jax.ShapeDtypeStruct((b_p, out_p), jnp.float32),
        grid_spec=pltpu.PrefetchScalarGridSpec(
            num_scalar_prefetch=0,
            grid=grid,
            in_specs=[
                pl.BlockSpec((tb, d_in_p), lambda i: (i, 0)),   # x tile streams
                resident(w1p.shape), resident(b1p.shape),
                resident(w2p.shape), resident(b2p.shape),
                resident(w3p.shape), resident(b3p.shape),
            ],
            out_specs=pl.BlockSpec((tb, out_p), lambda i: (i, 0)),
        ),
        compiler_params=pltpu.CompilerParams(
            dimension_semantics=("parallel",)),     # megacore split on v7x
    )(xp, w1p, b1p, w2p, b2p, w3p, b3p)

    # Strip batch/lane padding back to the logical output.
    return out[:B, :out_dim]


def init_linear(key, in_dim, out_dim):
    """Deterministic init mimicking torch.nn.Linear (uniform +-1/sqrt(fan_in))."""
    kw, kb = jax.random.split(key)
    bound = 1.0 / (in_dim ** 0.5)
    w = jax.random.uniform(kw, (in_dim, out_dim), jnp.float32, -bound, bound)
    b = jax.random.uniform(kb, (out_dim,), jnp.float32, -bound, bound)
    return w, b


if __name__ == "__main__":
    # Module hyperparameters (synthetic, small): input_dim=16, hidden_dim=32,
    # output dim fixed at 4 by the module definition.
    batch, input_dim, hidden_dim, out_dim = 8, 16, 32, 4

    key = jax.random.PRNGKey(0)
    kx, k1, k2, k3 = jax.random.split(key, 4)

    x = jax.random.normal(kx, (batch, input_dim), jnp.float32)
    w1, b1 = init_linear(k1, input_dim, hidden_dim)   # fc1
    w2, b2 = init_linear(k2, hidden_dim, hidden_dim)  # fc2
    w3, b3 = init_linear(k3, hidden_dim, out_dim)     # fc3
    # (fc2_1 exists in __init__ but is unused in forward, so it is omitted.)

    y = two_layer_nn(x, w1, b1, w2, b2, w3, b3)
    y = jax.block_until_ready(y)
    assert y.shape == (batch, out_dim)

    # Reference with the same bf16-input / f32-accumulate precision.
    bf16 = jnp.bfloat16
    ref = jnp.maximum(
        jnp.dot(x.astype(bf16), w1.astype(bf16),
                preferred_element_type=jnp.float32) + b1, 0.0)
    ref = jnp.maximum(
        jnp.dot(ref.astype(bf16), w2.astype(bf16),
                preferred_element_type=jnp.float32) + b2, 0.0)
    ref = jnp.dot(ref.astype(bf16), w3.astype(bf16),
                  preferred_element_type=jnp.float32) + b3
    assert jnp.allclose(y, ref, atol=1e-3, rtol=1e-3)

    # Loose check against the full-f32 reference (bf16 rounding of inputs).
    ref32 = jnp.maximum(x @ w1 + b1, 0.0)
    ref32 = jnp.maximum(ref32 @ w2 + b2, 0.0)
    ref32 = ref32 @ w3 + b3
    assert jnp.allclose(y, ref32, atol=5e-2, rtol=5e-2)

    print("KERNEL_OK")
</pallas_src>

<mosaic_0001>
module attributes {stable_mosaic.version = 11 : i64} {
  func.func @_two_layer_kernel(%arg0: i32, %arg1: memref<128x128xbf16, #tpu.memory_space<vmem>>, %arg2: memref<128x128xbf16, #tpu.memory_space<vmem>>, %arg3: memref<1x128xf32, #tpu.memory_space<vmem>>, %arg4: memref<128x128xbf16, #tpu.memory_space<vmem>>, %arg5: memref<1x128xf32, #tpu.memory_space<vmem>>, %arg6: memref<128x128xbf16, #tpu.memory_space<vmem>>, %arg7: memref<1x128xf32, #tpu.memory_space<vmem>>, %arg8: memref<128x128xf32, #tpu.memory_space<vmem>>) attributes {dimension_semantics = [#tpu.dimension_semantics<parallel>], iteration_bounds = array<i64: 1>, scalar_prefetch = 0 : i64, scratch_operands = 0 : i64, tpu.core_type = #tpu.core_type<tc>, window_params = [{transform_indices = @transform_0, window_bounds = array<i64: 128, 128>}, {pipeline_mode = #tpu.pipeline_mode<synchronous>, transform_indices = @transform_1, window_bounds = array<i64: 128, 128>}, {pipeline_mode = #tpu.pipeline_mode<synchronous>, transform_indices = @transform_2, window_bounds = array<i64: 1, 128>}, {pipeline_mode = #tpu.pipeline_mode<synchronous>, transform_indices = @transform_3, window_bounds = array<i64: 128, 128>}, {pipeline_mode = #tpu.pipeline_mode<synchronous>, transform_indices = @transform_4, window_bounds = array<i64: 1, 128>}, {pipeline_mode = #tpu.pipeline_mode<synchronous>, transform_indices = @transform_5, window_bounds = array<i64: 128, 128>}, {pipeline_mode = #tpu.pipeline_mode<synchronous>, transform_indices = @transform_6, window_bounds = array<i64: 1, 128>}, {transform_indices = @transform_7, window_bounds = array<i64: 128, 128>}]} {
    %c0 = arith.constant 0 : index
    %c0_0 = arith.constant 0 : index
    %0 = vector.load %arg1[%c0, %c0_0] : memref<128x128xbf16, #tpu.memory_space<vmem>>, vector<128x128xbf16>
    %c0_1 = arith.constant 0 : index
    %c0_2 = arith.constant 0 : index
    %1 = vector.load %arg2[%c0_1, %c0_2] : memref<128x128xbf16, #tpu.memory_space<vmem>>, vector<128x128xbf16>
    %cst = arith.constant dense<0.000000e+00> : vector<128x128xf32>
    %2 = tpu.matmul %0, %1, %cst {dimension_numbers = #tpu.dot_dimension_numbers<[1], [0], [0], [1], [0, 0, 1, 1], [], []>} : vector<128x128xbf16>, vector<128x128xbf16>, vector<128x128xf32> -> vector<128x128xf32>
    %c0_3 = arith.constant 0 : index
    %c0_4 = arith.constant 0 : index
    %3 = vector.load %arg3[%c0_3, %c0_4] : memref<1x128xf32, #tpu.memory_space<vmem>>, vector<1x128xf32>
    %4 = vector.broadcast %3 : vector<1x128xf32> to vector<128x128xf32>
    %5 = arith.addf %2, %4 : vector<128x128xf32>
    %cst_5 = arith.constant 0.000000e+00 : f32
    %6 = vector.broadcast %cst_5 : f32 to vector<128x128xf32>
    %7 = arith.maximumf %5, %6 : vector<128x128xf32>
    %8 = arith.truncf %7 : vector<128x128xf32> to vector<128x128xbf16>
    %c0_6 = arith.constant 0 : index
    %c0_7 = arith.constant 0 : index
    %9 = vector.load %arg4[%c0_6, %c0_7] : memref<128x128xbf16, #tpu.memory_space<vmem>>, vector<128x128xbf16>
    %cst_8 = arith.constant dense<0.000000e+00> : vector<128x128xf32>
    %10 = tpu.matmul %8, %9, %cst_8 {dimension_numbers = #tpu.dot_dimension_numbers<[1], [0], [0], [1], [0, 0, 1, 1], [], []>} : vector<128x128xbf16>, vector<128x128xbf16>, vector<128x128xf32> -> vector<128x128xf32>
    %c0_9 = arith.constant 0 : index
    %c0_10 = arith.constant 0 : index
    %11 = vector.load %arg5[%c0_9, %c0_10] : memref<1x128xf32, #tpu.memory_space<vmem>>, vector<1x128xf32>
    %12 = vector.broadcast %11 : vector<1x128xf32> to vector<128x128xf32>
    %13 = arith.addf %10, %12 : vector<128x128xf32>
    %cst_11 = arith.constant 0.000000e+00 : f32
    %14 = vector.broadcast %cst_11 : f32 to vector<128x128xf32>
    %15 = arith.maximumf %13, %14 : vector<128x128xf32>
    %16 = arith.truncf %15 : vector<128x128xf32> to vector<128x128xbf16>
    %c0_12 = arith.constant 0 : index
    %c0_13 = arith.constant 0 : index
    %17 = vector.load %arg6[%c0_12, %c0_13] : memref<128x128xbf16, #tpu.memory_space<vmem>>, vector<128x128xbf16>
    %cst_14 = arith.constant dense<0.000000e+00> : vector<128x128xf32>
    %18 = tpu.matmul %16, %17, %cst_14 {dimension_numbers = #tpu.dot_dimension_numbers<[1], [0], [0], [1], [0, 0, 1, 1], [], []>} : vector<128x128xbf16>, vector<128x128xbf16>, vector<128x128xf32> -> vector<128x128xf32>
    %c0_15 = arith.constant 0 : index
    %c0_16 = arith.constant 0 : index
    %19 = vector.load %arg7[%c0_15, %c0_16] : memref<1x128xf32, #tpu.memory_space<vmem>>, vector<1x128xf32>
    %20 = vector.broadcast %19 : vector<1x128xf32> to vector<128x128xf32>
    %21 = arith.addf %18, %20 : vector<128x128xf32>
    %c0_17 = arith.constant 0 : index
    %c0_18 = arith.constant 0 : index
    %22 = vector.load %arg8[%c0_17, %c0_18] : memref<128x128xf32, #tpu.memory_space<vmem>>, vector<128x128xf32>
    tpu.vector_store %arg8[%c0_17, %c0_18], %21 {strides = array<i32>} : memref<128x128xf32, #tpu.memory_space<vmem>>, vector<128x128xf32>,
    return
  }
  func.func @transform_0(%arg0: i32) -> (i32, i32) {
    %c0_i32 = arith.constant 0 : i32
    %c0_i32_0 = arith.constant 0 : i32
    return %arg0, %c0_i32 : i32, i32
  }
  func.func @transform_1(%arg0: i32) -> (i32, i32) {
    %c0_i32 = arith.constant 0 : i32
    %c0_i32_0 = arith.constant 0 : i32
    %c0_i32_1 = arith.constant 0 : i32
    return %c0_i32, %c0_i32_0 : i32, i32
  }
  func.func @transform_2(%arg0: i32) -> (i32, i32) {
    %c0_i32 = arith.constant 0 : i32
    %c0_i32_0 = arith.constant 0 : i32
    %c0_i32_1 = arith.constant 0 : i32
    return %c0_i32, %c0_i32_0 : i32, i32
  }
  func.func @transform_3(%arg0: i32) -> (i32, i32) {
    %c0_i32 = arith.constant 0 : i32
    %c0_i32_0 = arith.constant 0 : i32
    %c0_i32_1 = arith.constant 0 : i32
    return %c0_i32, %c0_i32_0 : i32, i32
  }
  func.func @transform_4(%arg0: i32) -> (i32, i32) {
    %c0_i32 = arith.constant 0 : i32
    %c0_i32_0 = arith.constant 0 : i32
    %c0_i32_1 = arith.constant 0 : i32
    return %c0_i32, %c0_i32_0 : i32, i32
  }
  func.func @transform_5(%arg0: i32) -> (i32, i32) {
    %c0_i32 = arith.constant 0 : i32
    %c0_i32_0 = arith.constant 0 : i32
    %c0_i32_1 = arith.constant 0 : i32
    return %c0_i32, %c0_i32_0 : i32, i32
  }
  func.func @transform_6(%arg0: i32) -> (i32, i32) {
    %c0_i32 = arith.constant 0 : i32
    %c0_i32_0 = arith.constant 0 : i32
    %c0_i32_1 = arith.constant 0 : i32
    return %c0_i32, %c0_i32_0 : i32, i32
  }
  func.func @transform_7(%arg0: i32) -> (i32, i32) {
    %c0_i32 = arith.constant 0 : i32
    %c0_i32_0 = arith.constant 0 : i32
    return %arg0, %c0_i32 : i32, i32
  }
}

</mosaic_0001>

<bundles_post_ra>
// kernel: tpu_custom_call.1
= control target key start
LH: loop header
LB: loop body
LE: loop exit
PB: predicated region body
PF: predicated region fallthrough
CT: control target
= control target key end

     0   :  { %12 = vsyncpa [#allocation3], 0  ;;  %s1268_s0 = inlined_call_operand.hbm [shape: bf16[128,128], index: 0, kind: input, shape index: {}]   ;;  %s1269_s1 = inlined_call_operand.hbm [shape: bf16[128,128], index: 1, kind: input, shape index: {}]   ;;  %s1270_s2 = inlined_call_operand.vmem [shape: f32[1,128], index: 2, kind: input, shape index: {}]   ;;  %s1271_s3 = inlined_call_operand.hbm [shape: bf16[128,128], index: 3, kind: input, shape index: {}]   ;;  %s1272_s4 = inlined_call_operand.vmem [shape: f32[1,128], index: 4, kind: input, shape index: {}]   ;;  %s1273_s5 = inlined_call_operand.hbm [shape: bf16[128,128], index: 5, kind: input, shape index: {}]   ;;  %s1274_s6 = inlined_call_operand.vmem [shape: f32[1,128], index: 6, kind: input, shape index: {}]   ;;  %s1275_s7 = inlined_call_operand.hbm [shape: f32[128,128], index: 7, kind: output, shape index: {}]  }
   0x1   :  { %13 = vsyncpa [#allocation6], 0 }
   0x2   :  { %14 = vsyncpa [#allocation9], 0 }
   0x3   :  { %15 = vsyncpa [#allocation4], 0  ;;  %s1088_s24 = smov [#allocation5]   ;;  %s1089_s26 = smov [#allocation2]  }
   0x4   :  { %s33_s25 = sshll.u32 %s1088_s24, 4  ;;  %s21_s27 = sshll.u32 %s1089_s26, 4  ;;  %s34_s25 = int_to_ptr.vmem [resolvable:$true] %s33_s25  ;;  %s1137_s27 = int_to_ptr.vmem [resolvable:$true] %s21_s27 }
   0x5   :  { %s970_s30 = scalar_lea.hbm %s1269_s1, 1024 }
   0x6   :  { %p971_p0 = scmp.ne.s32.totalorder %s1269_s1, %s970_s30  ;;  %p974_p1 = scmp.lt.u32.totalorder %s970_s30, %s1269_s1 }
   0x8   :  { %p976_p2 = pnand %p974_p1, %p971_p0 }
   0xa   :  { %979 = shalt.err (!%p976_p2)
}
   0xb   :  { %s980_s12 = scalar_lea.vmem %s34_s25, 1024  ;;  %p985_p4 = scmp.lt.s32.totalorder %s34_s25, %s34_s25 }
   0xc   :  { %p981_p3 = scmp.ne.s32.totalorder %s34_s25, %s980_s12  ;;  %p986_p5 = scmp.lt.s32.totalorder %s980_s12, %s980_s12 }
   0xe   :  { %p987_p6 = por %p986_p5, %p985_p4 }
  0x10   :  { %p988_p7 = pnand %p987_p6, %p981_p3 }
  0x12   :  { %991 = shalt.err (!%p988_p7)
}
  0x13   :  { %s1090_s13 = smov 64   ;;  %s1091_s14 = smov 4  }
  0x14   :  { %39 = dma.hbm_to_vmem [thread:$0]  %s1269_s1, 1024, %s34_s25, [#allocation6], %s1090_s13, %s1090_s13, %s1091_s14  }
  0x15   :  { %s992_s19 = scalar_lea.hbm %s1268_s0, 1024 }
  0x16   :  { %p993_p8 = scmp.ne.s32.totalorder %s1268_s0, %s992_s19  ;;  %p996_p9 = scmp.lt.u32.totalorder %s992_s19, %s1268_s0 }
  0x18   :  { %p998_p10 = pnand %p996_p9, %p993_p8 }
  0x1a   :  { %1001 = shalt.err (!%p998_p10)
}
  0x1b   :  { %s1002_s24 = scalar_lea.vmem %s1137_s27, 1024  ;;  %p1007_p12 = scmp.lt.s32.totalorder %s1137_s27, %s1137_s27 }
  0x1c   :  { %p1003_p11 = scmp.ne.s32.totalorder %s1137_s27, %s1002_s24  ;;  %p1008_p13 = scmp.lt.s32.totalorder %s1002_s24, %s1002_s24 }
  0x1e   :  { %p1009_p0 = por %p1008_p13, %p1007_p12 }
  0x20   :  { %p1010_p1 = pnand %p1009_p0, %p1003_p11 }
  0x22   :  { %1013 = shalt.err (!%p1010_p1)
}
  0x23   :  { %27 = dma.hbm_to_vmem [thread:$0]  %s1268_s0, 1024, %s1137_s27, [#allocation3], %s1090_s13, %s1090_s13, %s1091_s14  }
  0x24   :  { %s1092_s26 = smov [#allocation7]   ;;  %s1093_s29 = smov [#allocation8]  }
  0x25   :  { %s47_s28 = sshll.u32 %s1092_s26, 4  ;;  %s61_s30 = sshll.u32 %s1093_s29, 4  ;;  %s48_s28 = int_to_ptr.vmem [resolvable:$true] %s47_s28  ;;  %s1174_s30 = int_to_ptr.vmem [resolvable:$true] %s61_s30 }
  0x26   :  { %s1014_s10 = scalar_lea.hbm %s1271_s3, 1024 }
  0x27   :  { %p1015_p2 = scmp.ne.s32.totalorder %s1271_s3, %s1014_s10  ;;  %p1018_p3 = scmp.lt.u32.totalorder %s1014_s10, %s1271_s3 }
  0x29   :  { %p1020_p4 = pnand %p1018_p3, %p1015_p2 }
  0x2b   :  { %1023 = shalt.err (!%p1020_p4)
}
  0x2c   :  { %s1024_s0 = scalar_lea.vmem %s48_s28, 1024  ;;  %p1029_p6 = scmp.lt.s32.totalorder %s48_s28, %s48_s28 }
  0x2d   :  { %p1025_p5 = scmp.ne.s32.totalorder %s48_s28, %s1024_s0  ;;  %p1030_p7 = scmp.lt.s32.totalorder %s1024_s0, %s1024_s0 }
  0x2f   :  { %p1031_p8 = por %p1030_p7, %p1029_p6 }
  0x31   :  { %p1032_p9 = pnand %p1031_p8, %p1025_p5 }
  0x33   :  { %1035 = shalt.err (!%p1032_p9)
}
  0x34   :  { %53 = dma.hbm_to_vmem [thread:$0]  %s1271_s3, 1024, %s48_s28, [#allocation6], %s1090_s13, %s1090_s13, %s1091_s14  }
  0x35   :  { %s1036_s20 = scalar_lea.hbm %s1273_s5, 1024 }
  0x36   :  { %p1037_p10 = scmp.ne.s32.totalorder %s1273_s5, %s1036_s20  ;;  %p1040_p11 = scmp.lt.u32.totalorder %s1036_s20, %s1273_s5 }
  0x38   :  { %p1042_p12 = pnand %p1040_p11, %p1037_p10 }
  0x3a   :  { %1045 = shalt.err (!%p1042_p12)
}
  0x3b   :  { %s1046_s1 = scalar_lea.vmem %s1174_s30, 1024  ;;  %p1051_p0 = scmp.lt.s32.totalorder %s1174_s30, %s1174_s30 }
  0x3c   :  { %p1047_p13 = scmp.ne.s32.totalorder %s1174_s30, %s1046_s1  ;;  %p1052_p1 = scmp.lt.s32.totalorder %s1046_s1, %s1046_s1 }
  0x3e   :  { %p1053_p2 = por %p1052_p1, %p1051_p0 }
  0x40   :  { %p1054_p3 = pnand %p1053_p2, %p1047_p13 }
  0x42   :  { %1057 = shalt.err (!%p1054_p3)
}
  0x43   :  { %67 = dma.hbm_to_vmem [thread:$0]  %s1273_s5, 1024, %s1174_s30, [#allocation9], %s1090_s13, %s1090_s13, %s1091_s14  }
  0x44   :  { %1080 = dma.done.wait [#allocation3], 1024  }
  0x45   :  { %1081 = vsyncadd [#allocation3], 4294966272 }
  0x46   :  { %1082 = dma.done.wait [#allocation6], 2048  }
  0x47   :  { %1083 = vsyncadd [#allocation6], 4294965248 }
  0x48   :  { %1084 = dma.done.wait [#allocation9], 1024  }
  0x49   :  { %1085 = vsyncadd [#allocation9], 4294966272  ;;  %v938_v0 = vld [vmem:[#allocation5] sm:$0xff]   ;;  %v939_v1 = vld [vmem:[#allocation5 + $0x8] sm:$0xff]  }
  0x4a   :  { %817 = vmatprep.subr.bf16.mxu0 %v938_v0  ;;  %v940_v2 = vld [vmem:[#allocation5 + $0x10] sm:$0xff]   ;;  %v941_v3 = vld [vmem:[#allocation5 + $0x18] sm:$0xff]   ;;  %v946_v4 = vld [vmem:[#allocation2] sm:$0xff]  }
  0x4b   :  { %818 = vmatpush3.bf16.msra.mxu0 %v938_v0  ;;  %833 = vmatprep.mubr.bf16.mxu0 %v946_v4  ;;  %v942_v5 = vld [vmem:[#allocation5 + $0x20] sm:$0xff]   ;;  %v943_v6 = vld [vmem:[#allocation5 + $0x28] sm:$0xff]   ;;  %v944_v9 = vld [vmem:[#allocation5 + $0x30] sm:$0xff]  }
  0x4c   :  { %819 = vmatprep.subr.bf16.mxu0 %v939_v1  ;;  %v954_v7 = vld [vmem:[#allocation7] sm:$0xff]   ;;  %v955_v8 = vld [vmem:[#allocation7 + $0x8] sm:$0xff]   ;;  %v956_v10 = vld [vmem:[#allocation7 + $0x10] sm:$0xff]  }
  0x4d   :  { %849 = vmatprep.subr.bf16.mxu1 %v954_v7  ;;  %v945_v11 = vld [vmem:[#allocation5 + $0x38] sm:$0xff]   ;;  %v958_v13 = vld [vmem:[#allocation7 + $0x20] sm:$0xff]   ;;  %v947_v14 = vld [vmem:[#allocation2 + $0x8] sm:$0xff]  }
  0x4e   :  { %850 = vmatpush3.bf16.msra.mxu1 %v954_v7  ;;  %v957_v12 = vld [vmem:[#allocation7 + $0x18] sm:$0xff]   ;;  %v948_v15 = vld [vmem:[#allocation2 + $0x10] sm:$0xff]   ;;  %v959_v16 = vld [vmem:[#allocation7 + $0x28] sm:$0xff]  }
  0x4f   :  { %820 = vmatpush3.bf16.msra.mxu0 %v939_v1  ;;  %851 = vmatprep.subr.bf16.mxu1 %v955_v8  ;;  %v949_v17 = vld [vmem:[#allocation2 + $0x18] sm:$0xff]   ;;  %v950_v18 = vld [vmem:[#allocation2 + $0x20] sm:$0xff]   ;;  %v951_v19 = vld [vmem:[#allocation2 + $0x28] sm:$0xff]  }
  0x50   :  { %821 = vmatprep.subr.bf16.mxu0 %v940_v2  ;;  %v952_v20 = vld [vmem:[#allocation2 + $0x30] sm:$0xff]   ;;  %v953_v21 = vld [vmem:[#allocation2 + $0x38] sm:$0xff]   ;;  %v962_v24 = vld [vmem:[#allocation8] sm:$0xff]  }
  0x51   :  { %v960_v22 = vld [vmem:[#allocation7 + $0x30] sm:$0xff]   ;;  %v961_v23 = vld [vmem:[#allocation7 + $0x38] sm:$0xff]   ;;  %v963_v25 = vld [vmem:[#allocation8 + $0x8] sm:$0xff]  }
  0x52   :  { %852 = vmatpush3.bf16.msra.mxu1 %v955_v8  ;;  %v964_v26 = vld [vmem:[#allocation8 + $0x10] sm:$0xff]   ;;  %v1211_v27 = vld [vmem:[#allocation8 + $0x18] sm:$0xff]   ;;  %v1214_v28 = vld [vmem:[#allocation8 + $0x20] sm:$0xff]  }
  0x53   :  { %822 = vmatpush3.bf16.msra.mxu0 %v940_v2  ;;  %853 = vmatprep.subr.bf16.mxu1 %v956_v10  ;;  %v1218_v29 = vld [vmem:[#allocation8 + $0x28] sm:$0xff]   ;;  %v1226_v30 = vld [vmem:[%s1270_s2] ss:$0 sm:$0xff] }
  0x54   :  { %823 = vmatprep.subr.bf16.mxu0 %v941_v3 }
  0x56   :  { %854 = vmatpush3.bf16.msra.mxu1 %v956_v10 }
  0x57   :  { %824 = vmatpush3.bf16.msra.mxu0 %v941_v3  ;;  %855 = vmatprep.subr.bf16.mxu1 %v957_v12 }
  0x58   :  { %825 = vmatprep.subr.bf16.mxu0 %v942_v5 }
  0x5a   :  { %856 = vmatpush3.bf16.msra.mxu1 %v957_v12 }
  0x5b   :  { %826 = vmatpush3.bf16.msra.mxu0 %v942_v5  ;;  %857 = vmatprep.subr.bf16.mxu1 %v958_v13 }
  0x5c   :  { %827 = vmatprep.subr.bf16.mxu0 %v943_v6 }
  0x5e   :  { %858 = vmatpush3.bf16.msra.mxu1 %v958_v13 }
  0x5f   :  { %828 = vmatpush3.bf16.msra.mxu0 %v943_v6  ;;  %859 = vmatprep.subr.bf16.mxu1 %v959_v16 }
  0x60   :  { %829 = vmatprep.subr.bf16.mxu0 %v944_v9 }
  0x62   :  { %860 = vmatpush3.bf16.msra.mxu1 %v959_v16 }
  0x63   :  { %830 = vmatpush3.bf16.msra.mxu0 %v944_v9  ;;  %861 = vmatprep.subr.bf16.mxu1 %v960_v22 }
  0x64   :  { %831 = vmatprep.subr.bf16.mxu0 %v945_v11 }
  0x66   :  { %862 = vmatpush3.bf16.msra.mxu1 %v960_v22 }
  0x67   :  { %832 = vmatpush3.bf16.msra.mxu0 %v945_v11  ;;  %863 = vmatprep.subr.bf16.mxu1 %v961_v23 }
  0x68   :  { %881 = vmatprep.subr.bf16.mxu0 %v962_v24 }
  0x6a   :  { %834 = vmatmul.mubr.bf16.vlgmr.msra.gmra.mrb[0].mxu0 %v947_v14  ;;  %864 = vmatpush3.bf16.msra.mxu1 %v961_v23  ;;  %v968_v23 = vld [vmem:[#allocation8 + $0x30] sm:$0xff]  }
  0x6b   :  { %837 = vmatprep.mubr.bf16.mxu0 %v948_v15  ;;  %913 = vmatprep.subr.bf16.mxu1 %v962_v24 }
  0x6c   :  { %882 = vmatpush3.bf16.msra.mxu0 %v962_v24 }
  0x6d   :  { %883 = vmatprep.subr.bf16.mxu0 %v963_v25 }
  0x70   :  { %884 = vmatpush3.bf16.msra.mxu0 %v963_v25 }
  0x71   :  { %885 = vmatprep.subr.bf16.mxu0 %v964_v26 }
  0x72   :  { %838 = vmatmul.mubr.bf16.gmra.mrb[4].mxu0 %v949_v17 }
  0x73   :  { %841 = vmatprep.mubr.bf16.mxu0 %v950_v18 }
  0x74   :  { %886 = vmatpush3.bf16.msra.mxu0 %v964_v26 }
  0x75   :  { %887 = vmatprep.subr.bf16.mxu0 %v1211_v27 }
  0x78   :  { %888 = vmatpush3.bf16.msra.mxu0 %v1211_v27 }
  0x79   :  { %889 = vmatprep.subr.bf16.mxu0 %v1214_v28 }
  0x7a   :  { %842 = vmatmul.mubr.bf16.gmra.mrb[8].mxu0 %v951_v19 }
  0x7b   :  { %845 = vmatprep.mubr.bf16.mxu0 %v952_v20 }
  0x7c   :  { %890 = vmatpush3.bf16.msra.mxu0 %v1214_v28 }
  0x7d   :  { %891 = vmatprep.subr.bf16.mxu0 %v1218_v29 }
  0x80   :  { %892 = vmatpush3.bf16.msra.mxu0 %v1218_v29 }
  0x81   :  { %893 = vmatprep.subr.bf16.mxu0 %v968_v23 }
  0x82   :  { %846 = vmatmul.mubr.bf16.gmra.mrb[12].mxu0 %v953_v21 }
  0x84   :  { %894 = vmatpush3.bf16.msra.mxu0 %v968_v23 }
 0x13d   :  { %v835_v31 = vpop.f32.mrb[0].mxu0 }
 0x13e   :  { %v261_v32 = vadd.f32 %v835_v31, %v1226_v30  ;;  %v252_v33 = vpop.f32.mrb[1].mxu0 }
 0x13f   :  { %v253_v34 = vadd.f32 %v1226_v30, %v252_v33  ;;  %v836_v35 = vpop.f32.mrb[2].mxu0 }
 0x140   :  { %v264_v36 = vadd.f32 %v836_v35, %v1226_v30  ;;  %v255_v37 = vpop.f32.mrb[3].mxu0  ;;  %v317_v39 = vmax.f32 %v261_v32, 0.0 }
 0x141   :  { %v256_v38 = vadd.f32 %v1226_v30, %v255_v37  ;;  %v315_v41 = vmax.f32 %v253_v34, 0.0 }
 0x142   :  { %v318_v40 = vmax.f32 %v264_v36, 0.0 }
 0x143   :  { %v316_v42 = vmax.f32 %v256_v38, 0.0 }
 0x144   :  { %v332_v43 = vpack.c.bf16 %v318_v40, %v317_v39 }
 0x145   :  { %v839_v44 = vpop.f32.mrb[4].mxu0  ;;  %v331_v45 = vpack.c.bf16 %v316_v42, %v315_v41 }
 0x146   :  { %v277_v46 = vadd.f32 %v839_v44, %v1226_v30  ;;  %v268_v47 = vpop.f32.mrb[5].mxu0 }
 0x147   :  { %v269_v48 = vadd.f32 %v1226_v30, %v268_v47  ;;  %v840_v49 = vpop.f32.mrb[6].mxu0  ;;  %865 = vmatprep.mubr.bf16.mxu1 %v331_v45 }
 0x148   :  { %v280_v50 = vadd.f32 %v840_v49, %v1226_v30  ;;  %v271_v51 = vpop.f32.mrb[7].mxu0  ;;  %866 = vmatmul.mubr.bf16.vlgmr.msra.gmra.mrb[0].mxu1 %v332_v43  ;;  %v321_v53 = vmax.f32 %v277_v46, 0.0 }
 0x149   :  { %v272_v52 = vadd.f32 %v1226_v30, %v271_v51  ;;  %921 = vmatpush3.bf16.msra.mxu1 %v962_v24  ;;  %v319_v55 = vmax.f32 %v269_v48, 0.0  ;;  %v969_v24 = vld [vmem:[#allocation8 + $0x38] sm:$0xff]  }
 0x14a   :  { %v322_v54 = vmax.f32 %v280_v50, 0.0  ;;  %914 = vmatprep.subr.bf16.mxu1 %v963_v25  ;;  %895 = vmatprep.subr.bf16.mxu0 %v969_v24 }
 0x14b   :  { %v320_v56 = vmax.f32 %v272_v52, 0.0  ;;  %896 = vmatpush3.bf16.msra.mxu0 %v969_v24 }
 0x14c   :  { %v334_v57 = vpack.c.bf16 %v322_v54, %v321_v53 }
 0x14d   :  { %v333_v58 = vpack.c.bf16 %v320_v56, %v319_v55  ;;  %v843_v59 = vpop.f32.mrb[8].mxu0  ;;  %922 = vmatpush3.bf16.msra.mxu1 %v963_v25  ;;  %v751_v25 = vld [vmem:[%s1272_s4] ss:$0 sm:$0xff] }
 0x14e   :  { %v293_v60 = vadd.f32 %v843_v59, %v1226_v30  ;;  %v284_v61 = vpop.f32.mrb[9].mxu0  ;;  %915 = vmatprep.subr.bf16.mxu1 %v964_v26 }
 0x14f   :  { %v285_v62 = vadd.f32 %v1226_v30, %v284_v61  ;;  %v844_v63 = vpop.f32.mrb[10].mxu0  ;;  %869 = vmatprep.mubr.bf16.mxu1 %v333_v58 }
 0x150   :  { %v296_v0 = vadd.f32 %v844_v63, %v1226_v30  ;;  %v287_v1 = vpop.f32.mrb[11].mxu0  ;;  %870 = vmatmul.mubr.bf16.gmra.mrb[4].mxu1 %v334_v57  ;;  %v325_v3 = vmax.f32 %v293_v60, 0.0 }
 0x151   :  { %v288_v2 = vadd.f32 %v1226_v30, %v287_v1  ;;  %923 = vmatpush3.bf16.msra.mxu1 %v964_v26  ;;  %v323_v5 = vmax.f32 %v285_v62, 0.0 }
 0x152   :  { %v326_v4 = vmax.f32 %v296_v0, 0.0  ;;  %916 = vmatprep.subr.bf16.mxu1 %v1211_v27 }
 0x153   :  { %v324_v6 = vmax.f32 %v288_v2, 0.0 }
 0x154   :  { %v336_v7 = vpack.c.bf16 %v326_v4, %v325_v3 }
 0x155   :  { %v335_v8 = vpack.c.bf16 %v324_v6, %v323_v5  ;;  %v847_v9 = vpop.f32.mrb[12].mxu0  ;;  %924 = vmatpush3.bf16.msra.mxu1 %v1211_v27 }
 0x156   :  { %v309_v10 = vadd.f32 %v847_v9, %v1226_v30  ;;  %v300_v11 = vpop.f32.mrb[13].mxu0  ;;  %917 = vmatprep.subr.bf16.mxu1 %v1214_v28 }
 0x157   :  { %v301_v12 = vadd.f32 %v1226_v30, %v300_v11  ;;  %v848_v13 = vpop.f32.mrb[14].mxu0  ;;  %873 = vmatprep.mubr.bf16.mxu1 %v335_v8 }
 0x158   :  { %v312_v14 = vadd.f32 %v848_v13, %v1226_v30  ;;  %v303_v15 = vpop.f32.mrb[15].mxu0  ;;  %874 = vmatmul.mubr.bf16.gmra.mrb[8].mxu1 %v336_v7  ;;  %v329_v17 = vmax.f32 %v309_v10, 0.0 }
 0x159   :  { %v304_v16 = vadd.f32 %v1226_v30, %v303_v15  ;;  %925 = vmatpush3.bf16.msra.mxu1 %v1214_v28  ;;  %v327_v19 = vmax.f32 %v301_v12, 0.0 }
 0x15a   :  { %v330_v18 = vmax.f32 %v312_v14, 0.0  ;;  %918 = vmatprep.subr.bf16.mxu1 %v1218_v29 }
 0x15b   :  { %v328_v20 = vmax.f32 %v304_v16, 0.0 }
 0x15c   :  { %v338_v21 = vpack.c.bf16 %v330_v18, %v329_v17  ;;  %v760_v18 = vld [vmem:[%s1274_s6] ss:$0 sm:$0xff]  ;;  %s1094_s6 = smov [#allocation10]  }
 0x15d   :  { %v337_v22 = vpack.c.bf16 %v328_v20, %v327_v19  ;;  %926 = vmatpush3.bf16.msra.mxu1 %v1218_v29  ;;  %s720_s28 = sshll.u32 %s1094_s6, 4  ;;  %s721_s28 = int_to_ptr.vmem [resolvable:$true] %s720_s28 }
 0x15e   :  { %919 = vmatprep.subr.bf16.mxu1 %v968_v23  ;;  %s1058_s29 = scalar_lea.vmem %s721_s28, 2048  ;;  %p1063_p5 = scmp.lt.s32.totalorder %s721_s28, %s721_s28 }
 0x15f   :  { %877 = vmatprep.mubr.bf16.mxu1 %v337_v22  ;;  %p1059_p4 = scmp.ne.s32.totalorder %s721_s28, %s1058_s29  ;;  %p1064_p6 = scmp.lt.s32.totalorder %s1058_s29, %s1058_s29 }
 0x160   :  { %878 = vmatmul.mubr.bf16.gmra.mrb[12].mxu1 %v338_v21 }
 0x161   :  { %927 = vmatpush3.bf16.msra.mxu1 %v968_v23  ;;  %p1065_p7 = por %p1064_p6, %p1063_p5 }
 0x162   :  { %920 = vmatprep.subr.bf16.mxu1 %v969_v24 }
 0x163   :  { %p1066_p8 = pnand %p1065_p7, %p1059_p4 }
 0x165   :  { %928 = vmatpush3.bf16.msra.mxu1 %v969_v24 }
 0x21b   :  { %v867_v26 = vpop.f32.mrb[0].mxu1 }
 0x21c   :  { %v453_v27 = vadd.f32 %v867_v26, %v751_v25  ;;  %v444_v28 = vpop.f32.mrb[1].mxu1 }
 0x21d   :  { %v445_v29 = vadd.f32 %v751_v25, %v444_v28  ;;  %v868_v30 = vpop.f32.mrb[2].mxu1 }
 0x21e   :  { %v456_v31 = vadd.f32 %v868_v30, %v751_v25  ;;  %v447_v32 = vpop.f32.mrb[3].mxu1  ;;  %v509_v34 = vmax.f32 %v453_v27, 0.0 }
 0x21f   :  { %v448_v33 = vadd.f32 %v751_v25, %v447_v32  ;;  %v507_v36 = vmax.f32 %v445_v29, 0.0 }
 0x220   :  { %v510_v35 = vmax.f32 %v456_v31, 0.0 }
 0x221   :  { %v508_v37 = vmax.f32 %v448_v33, 0.0 }
 0x222   :  { %v524_v38 = vpack.c.bf16 %v510_v35, %v509_v34 }
 0x223   :  { %v523_v39 = vpack.c.bf16 %v508_v37, %v507_v36  ;;  %v871_v40 = vpop.f32.mrb[4].mxu1 }
 0x224   :  { %v469_v41 = vadd.f32 %v871_v40, %v751_v25  ;;  %v460_v42 = vpop.f32.mrb[5].mxu1 }
 0x225   :  { %v461_v43 = vadd.f32 %v751_v25, %v460_v42  ;;  %v872_v44 = vpop.f32.mrb[6].mxu1  ;;  %897 = vmatprep.mubr.bf16.mxu0 %v523_v39 }
 0x226   :  { %v472_v45 = vadd.f32 %v872_v44, %v751_v25  ;;  %v463_v46 = vpop.f32.mrb[7].mxu1  ;;  %898 = vmatmul.mubr.bf16.vlgmr.msra.gmra.mrb[16].mxu0 %v524_v38  ;;  %v513_v48 = vmax.f32 %v469_v41, 0.0 }
 0x227   :  { %v464_v47 = vadd.f32 %v751_v25, %v463_v46  ;;  %v511_v50 = vmax.f32 %v461_v43, 0.0 }
 0x228   :  { %v514_v49 = vmax.f32 %v472_v45, 0.0 }
 0x229   :  { %v512_v51 = vmax.f32 %v464_v47, 0.0 }
 0x22a   :  { %v526_v52 = vpack.c.bf16 %v514_v49, %v513_v48 }
 0x22b   :  { %v525_v53 = vpack.c.bf16 %v512_v51, %v511_v50  ;;  %v875_v54 = vpop.f32.mrb[8].mxu1 }
 0x22c   :  { %v485_v55 = vadd.f32 %v875_v54, %v751_v25  ;;  %v476_v56 = vpop.f32.mrb[9].mxu1 }
 0x22d   :  { %v477_v57 = vadd.f32 %v751_v25, %v476_v56  ;;  %v876_v58 = vpop.f32.mrb[10].mxu1  ;;  %901 = vmatprep.mubr.bf16.mxu0 %v525_v53 }
 0x22e   :  { %v488_v59 = vadd.f32 %v876_v58, %v751_v25  ;;  %v479_v60 = vpop.f32.mrb[11].mxu1  ;;  %902 = vmatmul.mubr.bf16.gmra.mrb[20].mxu0 %v526_v52  ;;  %v517_v62 = vmax.f32 %v485_v55, 0.0 }
 0x22f   :  { %v480_v61 = vadd.f32 %v751_v25, %v479_v60  ;;  %v515_v0 = vmax.f32 %v477_v57, 0.0 }
 0x230   :  { %v518_v63 = vmax.f32 %v488_v59, 0.0 }
 0x231   :  { %v516_v1 = vmax.f32 %v480_v61, 0.0 }
 0x232   :  { %v528_v2 = vpack.c.bf16 %v518_v63, %v517_v62 }
 0x233   :  { %v527_v3 = vpack.c.bf16 %v516_v1, %v515_v0  ;;  %v879_v4 = vpop.f32.mrb[12].mxu1 }
 0x234   :  { %v501_v5 = vadd.f32 %v879_v4, %v751_v25  ;;  %v492_v6 = vpop.f32.mrb[13].mxu1 }
 0x235   :  { %v493_v7 = vadd.f32 %v751_v25, %v492_v6  ;;  %v880_v8 = vpop.f32.mrb[14].mxu1  ;;  %905 = vmatprep.mubr.bf16.mxu1 %v527_v3 }
 0x236   :  { %v504_v9 = vadd.f32 %v880_v8, %v751_v25  ;;  %v495_v10 = vpop.f32.mrb[15].mxu1  ;;  %906 = vmatmul.mubr.bf16.vlgmr.msra.gmra.mrb[16].mxu1 %v528_v2  ;;  %v521_v12 = vmax.f32 %v501_v5, 0.0 }
 0x237   :  { %v496_v11 = vadd.f32 %v751_v25, %v495_v10  ;;  %v519_v14 = vmax.f32 %v493_v7, 0.0 }
 0x238   :  { %v522_v13 = vmax.f32 %v504_v9, 0.0 }
 0x239   :  { %v520_v15 = vmax.f32 %v496_v11, 0.0 }
 0x23a   :  { %v530_v16 = vpack.c.bf16 %v522_v13, %v521_v12 }
 0x23b   :  { %v529_v17 = vpack.c.bf16 %v520_v15, %v519_v14 }
 0x23d   :  { %909 = vmatprep.mubr.bf16.mxu1 %v529_v17 }
 0x23e   :  { %910 = vmatmul.mubr.bf16.gmra.mrb[20].mxu1 %v530_v16 }
 0x2f9   :  { %v899_v19 = vpop.f32.mrb[16].mxu0 }
 0x2fa   :  { %v645_v20 = vadd.f32 %v899_v19, %v760_v18  ;;  %v636_v21 = vpop.f32.mrb[17].mxu0 }
 0x2fb   :  { %v637_v22 = vadd.f32 %v760_v18, %v636_v21  ;;  %v900_v23 = vpop.f32.mrb[18].mxu0 }
 0x2fc   :  { %701 = vst [vmem:[#allocation10 + $0x10] sm:$0xff] %v645_v20  ;;  %v648_v24 = vadd.f32 %v900_v23, %v760_v18  ;;  %v639_v25 = vpop.f32.mrb[19].mxu0 }
 0x2fd   :  { %699 = vst [vmem:[#allocation10] sm:$0xff] %v637_v22  ;;  %v640_v26 = vadd.f32 %v760_v18, %v639_v25 }
 0x2fe   :  { %702 = vst [vmem:[#allocation10 + $0x18] sm:$0xff] %v648_v24 }
 0x2ff   :  { %700 = vst [vmem:[#allocation10 + $0x8] sm:$0xff] %v640_v26 }
 0x301   :  { %v903_v27 = vpop.f32.mrb[20].mxu0 }
 0x302   :  { %v661_v28 = vadd.f32 %v903_v27, %v760_v18  ;;  %v652_v29 = vpop.f32.mrb[21].mxu0 }
 0x303   :  { %v653_v30 = vadd.f32 %v760_v18, %v652_v29  ;;  %v904_v31 = vpop.f32.mrb[22].mxu0 }
 0x304   :  { %705 = vst [vmem:[#allocation10 + $0x30] sm:$0xff] %v661_v28  ;;  %v664_v32 = vadd.f32 %v904_v31, %v760_v18  ;;  %v655_v33 = vpop.f32.mrb[23].mxu0 }
 0x305   :  { %703 = vst [vmem:[#allocation10 + $0x20] sm:$0xff] %v653_v30  ;;  %v656_v34 = vadd.f32 %v760_v18, %v655_v33 }
 0x306   :  { %706 = vst [vmem:[#allocation10 + $0x38] sm:$0xff] %v664_v32 }
 0x307   :  { %704 = vst [vmem:[#allocation10 + $0x28] sm:$0xff] %v656_v34 }
 0x309   :  { %v907_v35 = vpop.f32.mrb[16].mxu1 }
 0x30a   :  { %v677_v36 = vadd.f32 %v907_v35, %v760_v18  ;;  %v668_v37 = vpop.f32.mrb[17].mxu1 }
 0x30b   :  { %v669_v38 = vadd.f32 %v760_v18, %v668_v37  ;;  %v908_v39 = vpop.f32.mrb[18].mxu1 }
 0x30c   :  { %709 = vst [vmem:[#allocation10 + $0x50] sm:$0xff] %v677_v36  ;;  %v680_v40 = vadd.f32 %v908_v39, %v760_v18  ;;  %v671_v41 = vpop.f32.mrb[19].mxu1 }
 0x30d   :  { %707 = vst [vmem:[#allocation10 + $0x40] sm:$0xff] %v669_v38  ;;  %v672_v42 = vadd.f32 %v760_v18, %v671_v41 }
 0x30e   :  { %710 = vst [vmem:[#allocation10 + $0x58] sm:$0xff] %v680_v40 }
 0x30f   :  { %708 = vst [vmem:[#allocation10 + $0x48] sm:$0xff] %v672_v42 }
 0x311   :  { %v911_v43 = vpop.f32.mrb[20].mxu1 }
 0x312   :  { %v693_v44 = vadd.f32 %v911_v43, %v760_v18  ;;  %v684_v45 = vpop.f32.mrb[21].mxu1 }
 0x313   :  { %v685_v46 = vadd.f32 %v760_v18, %v684_v45  ;;  %v912_v47 = vpop.f32.mrb[22].mxu1 }
 0x314   :  { %713 = vst [vmem:[#allocation10 + $0x70] sm:$0xff] %v693_v44  ;;  %v696_v48 = vadd.f32 %v912_v47, %v760_v18  ;;  %v687_v49 = vpop.f32.mrb[23].mxu1 }
 0x315   :  { %711 = vst [vmem:[#allocation10 + $0x60] sm:$0xff] %v685_v46  ;;  %v688_v50 = vadd.f32 %v760_v18, %v687_v49 }
 0x316   :  { %714 = vst [vmem:[#allocation10 + $0x78] sm:$0xff] %v696_v48 }
 0x317   :  { %712 = vst [vmem:[#allocation10 + $0x68] sm:$0xff] %v688_v50 }
 0x318   :  { %1069 = shalt.err (!%p1066_p8)
}
 0x319   :  { %s1070_s9 = scalar_lea.hbm %s1275_s7, 2048 }
 0x31a   :  { %p1071_p9 = scmp.ne.s32.totalorder %s1275_s7, %s1070_s9  ;;  %p1074_p10 = scmp.lt.u32.totalorder %s1070_s9, %s1275_s7 }
 0x31c   :  { %p1076_p11 = pnand %p1074_p10, %p1071_p9 }
 0x31e   :  { %1079 = shalt.err (!%p1076_p11)
}
 0x31f   :  { %s1095_s16 = smov 128   ;;  %s1096_s0 = smov 8  }
 0x320   :  { %726 = dma.vmem_to_hbm [thread:$0]  %s721_s28, 2048, %s1275_s7, [#allocation4], %s1095_s16, %s1095_s16, %s1096_s0  }
 0x321   :  { %1086 = dma.done.wait [#allocation4], 2048  }
 0x322   :  { %1087 = vsyncadd [#allocation4], 4294965248 }
 0x323   :  { %730 = vsyncpa [#allocation3], 1 }
 0x324   :  { %731 = vsyncpa [#allocation6], 1 }
 0x325   :  { %732 = vsyncpa [#allocation9], 1 }
 0x326   :  { %733 = vsyncpa [#allocation4], 1 }

</bundles_post_ra>
